<compile_context>
chip_gen: v7x
topology: tpu7x:2x2x1
jax: 0.10.0
libtpu: 0.0.40
codegen_flags: <defaults>
</compile_context>

<pallas_src>
import functools

import jax
import jax.numpy as jnp
from jax import lax
from jax.experimental import pallas as pl
from jax.experimental.pallas import tpu as pltpu


def _round_up(x, m):
    return ((x + m - 1) // m) * m


def _conv_stats_kernel(a_ref, w_ref, y_ref, stats_ref):
    """One GEMM row tile of the conv + partial BN statistics.

    a_ref:     (TM, Kp)  bf16  im2col tile (zero padded)
    w_ref:     (Kp, Cp)  bf16  reshaped conv weight (zero padded)
    y_ref:     (TM, Cp)  f32   conv output tile (lane dense)
    stats_ref: (8,  Cp)  f32   row0 = per-channel sum, row1 = sum of squares
    """
    acc = jnp.dot(a_ref[...], w_ref[...], preferred_element_type=jnp.float32)
    y_ref[...] = acc
    s = jnp.sum(acc, axis=0, keepdims=True)                    # (1, Cp)
    sq = jnp.sum(acc * acc, axis=0, keepdims=True)             # (1, Cp)
    pad = jnp.zeros((stats_ref.shape[0] - 2, s.shape[1]), jnp.float32)
    stats_ref[...] = jnp.concatenate([s, sq, pad], axis=0)


def _bn_relu_kernel(y_ref, stats_ref, gb_ref, o_ref, *, count, eps):
    """Finalize BN stats, normalize + affine + ReLU for one row tile.

    y_ref:     (TM, Cp)     f32  conv output tile
    stats_ref: (T, 8, Cp)   f32  partial stats from pass 1 (whole, tiny)
    gb_ref:    (8, Cp)      f32  row0 = gamma, row1 = beta
    o_ref:     (TM, Cp)     f32  output tile
    """
    tot = jnp.sum(stats_ref[...], axis=0)                      # (8, Cp)
    s = tot[0:1, :]
    sq = tot[1:2, :]
    mean = s * (1.0 / count)
    var = jnp.maximum(sq * (1.0 / count) - mean * mean, 0.0)   # biased batch var
    inv = lax.rsqrt(var + eps)
    gamma = gb_ref[0:1, :]
    beta = gb_ref[1:2, :]
    scale = gamma * inv
    shift = beta - mean * scale
    o_ref[...] = jnp.maximum(y_ref[...] * scale + shift, 0.0)


def basic_block_forward(x_nchw, weight_oihw, gamma, beta, *, eps=1e-5,
                        tile_m=256, mxu_dtype=jnp.bfloat16):
    """Conv2d(bias=False, 'same') + BatchNorm2d(batch stats) + ReLU.

    x_nchw:      (N, Cin, H, W)    float32
    weight_oihw: (Cout, Cin, K, K) float32 (PyTorch Conv2d layout)
    gamma, beta: (Cout,)           float32 (BatchNorm2d affine params)
    returns:     (N, Cout, H, W)   float32
    """
    n, cin, h, w = x_nchw.shape
    cout, cin2, k, k2 = weight_oihw.shape
    assert cin2 == cin and k2 == k
    assert k % 2 == 1, "padding=(k-1)//2 matches 'same' only for odd kernels"
    pad = (k - 1) // 2

    m = n * h * w
    kdim = k * k * cin
    kp = _round_up(kdim, 128)            # lane-dense contraction dim
    cp = _round_up(cout, 128)            # lane-dense output channel dim
    tm = min(tile_m, _round_up(m, 8))
    mp = _round_up(m, tm)
    n_tiles = mp // tm

    # ---- layout prep (small, one-shot, fused by XLA) ------------------------
    # NCHW -> NHWC, 'same' zero pad, im2col (M, K*K*Cin), pad, cast to bf16.
    # TODO(synk): at real ResNet sizes fold pad + im2col into the kernel with a
    # halo-tiled index_map instead of materializing A in HBM.
    x_nhwc = jnp.transpose(x_nchw, (0, 2, 3, 1)).astype(jnp.float32)
    xp = jnp.pad(x_nhwc, ((0, 0), (pad, pad), (pad, pad), (0, 0)))
    cols = []
    for kh in range(k):
        for kw in range(k):
            cols.append(xp[:, kh:kh + h, kw:kw + w, :])        # (N, H, W, Cin)
    a = jnp.stack(cols, axis=3).reshape(m, kdim)               # (M, K*K*Cin)
    a = jnp.pad(a, ((0, mp - m), (0, kp - kdim))).astype(mxu_dtype)

    # OIHW -> (kh, kw, cin, cout) -> (K*K*Cin, Cout), zero padded.
    wm = jnp.transpose(weight_oihw, (2, 3, 1, 0)).reshape(kdim, cout)
    wm = jnp.pad(wm.astype(jnp.float32), ((0, kp - kdim), (0, cp - cout)))
    wm = wm.astype(mxu_dtype)

    gb = jnp.zeros((8, cp), jnp.float32)
    gb = gb.at[0, :cout].set(gamma.astype(jnp.float32))
    gb = gb.at[1, :cout].set(beta.astype(jnp.float32))

    cparams = pltpu.CompilerParams(
        dimension_semantics=("parallel",),
        vmem_limit_bytes=32 * 1024 * 1024,
    )

    # ---- pass 1: conv GEMM + per-tile partial BN statistics ----------------
    y_conv, stats = pl.pallas_call(
        _conv_stats_kernel,
        grid=(n_tiles,),
        in_specs=[
            pl.BlockSpec((tm, kp), lambda i: (i, 0)),
            pl.BlockSpec((kp, cp), lambda i: (0, 0)),
        ],
        out_specs=[
            pl.BlockSpec((tm, cp), lambda i: (i, 0)),
            pl.BlockSpec((None, 8, cp), lambda i: (i, 0, 0)),
        ],
        out_shape=[
            jax.ShapeDtypeStruct((mp, cp), jnp.float32),
            jax.ShapeDtypeStruct((n_tiles, 8, cp), jnp.float32),
        ],
        compiler_params=cparams,
    )(a, wm)

    # ---- pass 2: finalize stats, normalize + affine + ReLU ------------------
    kernel2 = functools.partial(_bn_relu_kernel, count=float(m), eps=float(eps))
    out_flat = pl.pallas_call(
        kernel2,
        grid=(n_tiles,),
        in_specs=[
            pl.BlockSpec((tm, cp), lambda i: (i, 0)),
            pl.BlockSpec((n_tiles, 8, cp), lambda i: (0, 0, 0)),
            pl.BlockSpec((8, cp), lambda i: (0, 0)),
        ],
        out_specs=pl.BlockSpec((tm, cp), lambda i: (i, 0)),
        out_shape=jax.ShapeDtypeStruct((mp, cp), jnp.float32),
        compiler_params=cparams,
    )(y_conv, stats, gb)

    # Slice valid rows/channels, back to NCHW to match the PyTorch module.
    out = out_flat[:m, :cout].reshape(n, h, w, cout)
    return jnp.transpose(out, (0, 3, 1, 2))


def _reference_forward(x_nchw, weight_oihw, gamma, beta, *, eps=1e-5):
    """Plain-JAX reference (conv + training-mode BN + relu) for validation."""
    y = lax.conv_general_dilated(
        x_nchw.astype(jnp.float32), weight_oihw.astype(jnp.float32),
        window_strides=(1, 1), padding="SAME",
        dimension_numbers=("NCHW", "OIHW", "NCHW"))
    mean = jnp.mean(y, axis=(0, 2, 3), keepdims=True)
    var = jnp.mean((y - mean) ** 2, axis=(0, 2, 3), keepdims=True)
    yn = (y - mean) * lax.rsqrt(var + eps)
    yn = yn * gamma.reshape(1, -1, 1, 1) + beta.reshape(1, -1, 1, 1)
    return jnp.maximum(yn, 0.0)


if __name__ == "__main__":
    # Small shapes consistent with the module's forward: NCHW image input.
    N, C_IN, H, W = 2, 4, 16, 16
    C_OUT, K = 8, 3

    key = jax.random.PRNGKey(0)
    kx, kw = jax.random.split(key)

    x = jax.random.normal(kx, (N, C_IN, H, W), dtype=jnp.float32)
    # Deterministic conv weight (fan-in scaled normal); BN affine defaults.
    weight = (jax.random.normal(kw, (C_OUT, C_IN, K, K), dtype=jnp.float32)
              / jnp.sqrt(C_IN * K * K))
    gamma = jnp.ones((C_OUT,), dtype=jnp.float32)   # BatchNorm2d default
    beta = jnp.zeros((C_OUT,), dtype=jnp.float32)

    out = basic_block_forward(x, weight, gamma, beta)
    out = jax.block_until_ready(out)

    ref = _reference_forward(x, weight, gamma, beta)
    assert out.shape == (N, C_OUT, H, W)
    err = float(jnp.max(jnp.abs(out - ref)))
    assert err < 5e-2, f"max abs err {err}"  # bf16 MXU operands, f32 accumulate

    print("KERNEL_OK")
</pallas_src>

<mosaic_0001>
module attributes {stable_mosaic.version = 11 : i64} {
  func.func @_conv_stats_kernel(%arg0: i32, %arg1: memref<256x128xbf16, #tpu.memory_space<vmem>>, %arg2: memref<128x128xbf16, #tpu.memory_space<vmem>>, %arg3: memref<256x128xf32, #tpu.memory_space<vmem>>, %arg4: memref<1x8x128xf32, #tpu.memory_space<vmem>>) attributes {dimension_semantics = [#tpu.dimension_semantics<parallel>], iteration_bounds = array<i64: 2>, scalar_prefetch = 0 : i64, scratch_operands = 0 : i64, tpu.core_type = #tpu.core_type<tc>, window_params = [{transform_indices = @transform_0, window_bounds = array<i64: 256, 128>}, {pipeline_mode = #tpu.pipeline_mode<synchronous>, transform_indices = @transform_1, window_bounds = array<i64: 128, 128>}, {transform_indices = @transform_2, window_bounds = array<i64: 256, 128>}, {transform_indices = @transform_3, window_bounds = array<i64: 1, 8, 128>}]} {
    %c0 = arith.constant 0 : index
    %c0_0 = arith.constant 0 : index
    %0 = vector.load %arg1[%c0, %c0_0] : memref<256x128xbf16, #tpu.memory_space<vmem>>, vector<256x128xbf16>
    %c0_1 = arith.constant 0 : index
    %c0_2 = arith.constant 0 : index
    %1 = vector.load %arg2[%c0_1, %c0_2] : memref<128x128xbf16, #tpu.memory_space<vmem>>, vector<128x128xbf16>
    %cst = arith.constant dense<0.000000e+00> : vector<256x128xf32>
    %2 = tpu.matmul %0, %1, %cst {dimension_numbers = #tpu.dot_dimension_numbers<[1], [0], [0], [1], [0, 0, 1, 1], [], []>} : vector<256x128xbf16>, vector<128x128xbf16>, vector<256x128xf32> -> vector<256x128xf32>
    %c0_3 = arith.constant 0 : index
    %c0_4 = arith.constant 0 : index
    %3 = vector.load %arg3[%c0_3, %c0_4] : memref<256x128xf32, #tpu.memory_space<vmem>>, vector<256x128xf32>
    tpu.vector_store %arg3[%c0_3, %c0_4], %2 {strides = array<i32>} : memref<256x128xf32, #tpu.memory_space<vmem>>, vector<256x128xf32>,
    %cst_5 = arith.constant dense<0.000000e+00> : vector<128xf32>
    %4 = vector.multi_reduction <add>, %2, %cst_5 [0] : vector<256x128xf32> to vector<128xf32>
    %5 = vector.shape_cast %4 : vector<128xf32> to vector<1x128xf32>
    %6 = arith.mulf %2, %2 : vector<256x128xf32>
    %cst_6 = arith.constant dense<0.000000e+00> : vector<128xf32>
    %7 = vector.multi_reduction <add>, %6, %cst_6 [0] : vector<256x128xf32> to vector<128xf32>
    %8 = vector.shape_cast %7 : vector<128xf32> to vector<1x128xf32>
    %cst_7 = arith.constant 0.000000e+00 : f32
    %9 = vector.broadcast %cst_7 : f32 to vector<6x128xf32>
    %10 = tpu.concatenate %5, %8, %9 in 0 : vector<1x128xf32>, vector<1x128xf32>, vector<6x128xf32> -> vector<8x128xf32>
    %c0_8 = arith.constant 0 : index
    %c0_9 = arith.constant 0 : index
    %c0_10 = arith.constant 0 : index
    %11 = vector.load %arg4[%c0_8, %c0_9, %c0_10] : memref<1x8x128xf32, #tpu.memory_space<vmem>>, vector<1x8x128xf32>
    %12 = vector.shape_cast %11 : vector<1x8x128xf32> to vector<8x128xf32>
    %13 = vector.shape_cast %10 : vector<8x128xf32> to vector<1x8x128xf32>
    tpu.vector_store %arg4[%c0_8, %c0_9, %c0_10], %13 {strides = array<i32>} : memref<1x8x128xf32, #tpu.memory_space<vmem>>, vector<1x8x128xf32>,
    return
  }
  func.func @transform_0(%arg0: i32) -> (i32, i32) {
    %c0_i32 = arith.constant 0 : i32
    %c0_i32_0 = arith.constant 0 : i32
    return %arg0, %c0_i32 : i32, i32
  }
  func.func @transform_1(%arg0: i32) -> (i32, i32) {
    %c0_i32 = arith.constant 0 : i32
    %c0_i32_0 = arith.constant 0 : i32
    %c0_i32_1 = arith.constant 0 : i32
    return %c0_i32, %c0_i32_0 : i32, i32
  }
  func.func @transform_2(%arg0: i32) -> (i32, i32) {
    %c0_i32 = arith.constant 0 : i32
    %c0_i32_0 = arith.constant 0 : i32
    return %arg0, %c0_i32 : i32, i32
  }
  func.func @transform_3(%arg0: i32) -> (i32, i32, i32) {
    %c0_i32 = arith.constant 0 : i32
    %c0_i32_0 = arith.constant 0 : i32
    %c0_i32_1 = arith.constant 0 : i32
    return %arg0, %c0_i32, %c0_i32_0 : i32, i32, i32
  }
}

</mosaic_0001>

<bundles_post_ra>
// kernel: tpu_custom_call.1
= control target key start
LH: loop header
LB: loop body
LE: loop exit
PB: predicated region body
PF: predicated region fallthrough
CT: control target
= control target key end

     0   :  { %9 = vsyncpa [#allocation3], 0  ;;  %s1662_s0 = inlined_call_operand.hbm [shape: bf16[512,128], index: 0, kind: input, shape index: {}]   ;;  %s1663_s1 = inlined_call_operand.hbm [shape: bf16[128,128], index: 1, kind: input, shape index: {}]   ;;  %s1664_s2 = inlined_call_operand.hbm [shape: f32[512,128], index: 2, kind: output, shape index: {0}]   ;;  %s1665_s3 = inlined_call_operand.hbm [shape: f32[2,8,128], index: 3, kind: output, shape index: {1}]  }
   0x1   :  { %11 = vsyncpa [#allocation3 + $0x1], 0 }
   0x2   :  { %12 = vsyncpa [#allocation6], 0 }
   0x3   :  { %13 = vsyncpa [#allocation4], 0 }
   0x4   :  { %15 = vsyncpa [#allocation4 + $0x1], 0 }
   0x5   :  { %16 = vsyncpa [#allocation9], 0 }
   0x6   :  { %18 = vsyncpa [#allocation9 + $0x1], 0  ;;  %s1274_s12 = smov 0   ;;  %s1276_s13 = smov 0  }
   0x7   :  { %s1278_s14 = smov 0   ;;  %s1280_s15 = smov 0  }
   0x8 LB: > { %s1295_s16 = sadd.s32 4294967295, %s1244_s15   ;;  %s861_s17 = sadd.s32 4294967294, %s1244_s15   ;;  %s1244_s15 = sphi %s1280_s15, %s1685_s15   ;;  %s1240_s14 = sphi %s1278_s14, %s1684_s14   ;;  %s1236_s13 = sphi %s1276_s13, %s1683_s13   ;;  %s1232_s12 = sphi %s1274_s12, %s1682_s12  }
   0x9   : > { %p44_p0 = scmp.ne.s32.totalorder %s1236_s13, %s1232_s12  ;;  %p1666_p1 = scmp.eq.s32.totalorder %s1295_s16, 0 }
   0xa   : > { %p95_p3 = scmp.eq.s32.totalorder %s861_s17, 1  ;;  %p862_p5 = scmp.ge.s32.totalorder %s1244_s15, 1 }
   0xb   : > { %p1304_p4 = por %p1666_p1, %p44_p0  ;;  %p128_p7 = scmp.lt.s32.totalorder %s1244_s15, 3 }
   0xc   : > { %p1309_p6 = por %p95_p3, %p44_p0  ;;  %s1246_s21 = smov [#allocation5]  }
   0xd   : > { %s1669_s18 = scalar_select %p1304_p4, 1, 0 }
   0xe   : > { %s1670_s19 = scalar_select %p1309_p6, 1, 0 }
   0xf   : > { %p1314_p8 = pnand %p862_p5, %p128_p7  ;;  %s140_s22 = sshll.u32 %s1246_s21, 4  ;;  %s1318_s22 = int_to_ptr.vmem [resolvable:$true] %s140_s22 }
  0x10   : > { %s1330_s24 = sadd.s32 1, %s1244_s15   ;;  %s31_s25 = sadd.s32 1, %s1240_s14 }
  0x11   : > { %s1671_s20 = scalar_select %p1314_p8, 1, 0 }
  0x12   : > { %p1004_p9 = pneg %p1314_p8  ;;  %s28_s26 = ssub.s32 %s1244_s15, %s1330_s24 }
  0x13   : > { %s1084_s29 = scalar_lea.hbm %s1663_s1, 1024 }
  0x14   : > { %p1325_p11 = pnand %p1004_p9, %p1666_p1  ;;  %p1085_p12 = scmp.ne.s32.totalorder %s1663_s1, %s1084_s29 }
  0x15   : > { %p1091_p5 = scmp.lt.u32.totalorder %s1084_s29, %s1663_s1 }
  0x16   : > { %p1086_p13 = pneg %p1325_p11 }
  0x18   : > { %p1087_p0 = pnand %p1086_p13, %p1085_p12 }
  0x1a   : > { %p1088_p3 = pneg %p1087_p0 }
  0x1c   : > { %p1093_p7 = pnand %p1091_p5, %p1088_p3 }
  0x1e   : > { %1096 = shalt.err (!%p1093_p7)
}
  0x1f   : > { %s1097_s7 = scalar_lea.vmem %s1318_s22, 1024  ;;  %p1105_p2 = scmp.lt.s32.totalorder %s1318_s22, %s1318_s22 }
  0x20   : > { %p1098_p9 = scmp.ne.s32.totalorder %s1318_s22, %s1097_s7  ;;  %p1106_p6 = scmp.lt.s32.totalorder %s1097_s7, %s1097_s7 }
  0x22   : > { %p1100_p10 = pnand %p1098_p9, %p1086_p13  ;;  %p1107_p4 = por %p1106_p6, %p1105_p2 }
  0x24   : > { %p1101_p1 = pneg %p1100_p10 }
  0x26   : > { %p1108_p8 = pnand %p1107_p4, %p1101_p1 }
  0x28   : > { %1111 = shalt.err (!%p1108_p8)
}
  0x29   : > { %s1247_s8 = smov 64   ;;  %s1248_s9 = smov 4  }
  0x2a   : > { %1007 = dma.hbm_to_vmem [thread:$0]  (!%p1325_p11), %s1663_s1, 1024, %s1318_s22, [#allocation6], %s1247_s8, %s1247_s8, %s1248_s9  }
  0x2b   : > { %p29_p1 = scmp.eq.s32.totalorder %s28_s26, 0  ;;  %p38_p2 = scmp.ne.s32.totalorder %s1240_s14, %s1236_s13 }
  0x2c   : > { %p39_p4 = scmp.eq.s32.totalorder %s1244_s15, 0  ;;  %p1020_p6 = scmp.lt.s32.totalorder %s1244_s15, 2 }
  0x2d   : > { %s1364_s17 = scalar_select %p29_p1, %s1240_s14, %s31_s25  }
  0x2e   : > { %p40_p8 = por %p39_p4, %p38_p2  ;;  %p1673_p10 = scmp.eq.s32.totalorder %s1295_s16, 1 }
  0x2f   : > { %s154_s23 = sand.u32 1, %s1240_s14   ;;  %s904_s27 = sshll.u32 %s1244_s15, 11 }
  0x30   : > { %p1368_p12 = por %p1673_p10, %p38_p2  ;;  %s865_s28 = sshll.u32 %s154_s23, 7 }
  0x31   : > { %s1377_s4 = scalar_lea.hbm %s1662_s0, %s904_s27  ;;  %s158_s22 = scalar_lea.vmem [#allocation2], %s865_s28 }
  0x32   : > { %s165_s25 = sshll.u32 %s158_s22, 4  ;;  %p1379_p11 = pnand %p1020_p6, %p40_p8  ;;  %s1383_s25 = int_to_ptr.vmem [resolvable:$true] %s165_s25 }
  0x33   : > { %s1385_s5 = scalar_lea.sflag [#allocation3], %s154_s23  ;;  %s1112_s6 = scalar_lea.hbm %s1377_s4, 2048 }
  0x34   : > { %p1113_p13 = scmp.ne.s32.totalorder %s1377_s4, %s1112_s6  ;;  %p1114_p0 = pneg %p1379_p11 }
  0x35   : > { %s1117_s11 = scalar_lea.hbm %s1662_s0, 4096  ;;  %p1118_p7 = scmp.lt.u32.totalorder %s1377_s4, %s1662_s0 }
  0x36   : > { %p1115_p3 = pnand %p1114_p0, %p1113_p13  ;;  %p1119_p9 = scmp.lt.u32.totalorder %s1117_s11, %s1112_s6 }
  0x37   : > { %p1121_p2 = scmp.lt.u32.totalorder %s1112_s6, %s1377_s4 }
  0x38   : > { %p1116_p5 = pneg %p1115_p3  ;;  %p1120_p1 = por %p1119_p9, %p1118_p7 }
  0x3a   : > { %p1122_p4 = por %p1121_p2, %p1120_p1 }
  0x3c   : > { %p1123_p6 = pnand %p1122_p4, %p1116_p5 }
  0x3e   : > { %1126 = shalt.err (!%p1123_p6)
}
  0x3f   : > { %s1127_s23 = scalar_lea.vmem %s1383_s25, 2048  ;;  %s1249_s29 = smov [#allocation2]  }
  0x40   : > { %p1128_p8 = scmp.ne.s32.totalorder %s1383_s25, %s1127_s23  ;;  %s1132_s30 = sshll.u32 %s1249_s29, 4  ;;  %s1133_s30 = int_to_ptr.vmem [resolvable:$false] %s1132_s30 }
  0x41   : > { %s1134_s22 = scalar_lea.vmem %s1133_s30, 4096  ;;  %p1135_p3 = scmp.lt.s32.totalorder %s1383_s25, %s1133_s30 }
  0x42   : > { %p1130_p10 = pnand %p1128_p8, %p1114_p0  ;;  %p1136_p7 = scmp.lt.s32.totalorder %s1134_s22, %s1127_s23 }
  0x44   : > { %p1131_p13 = pneg %p1130_p10  ;;  %p1137_p9 = por %p1136_p7, %p1135_p3 }
  0x46   : > { %p1138_p1 = pnand %p1137_p9, %p1131_p13 }
  0x48   : > { %1141 = shalt.err (!%p1138_p1)
}
  0x49   : > { %1011 = dma.hbm_to_vmem [thread:$0]  (!%p1379_p11), %s1377_s4, 2048, %s1383_s25, %s1385_s5, %s1247_s8, %s1247_s8, %s1248_s9  }
  0x4a   : > { %p1676_p0 = scmp.ne.s32.totalorder %s1671_s20, 0 }
  0x4b   : > { %s1419_s6 = sand.u32 (!%p1676_p0), 1, %s1236_s13   ;;  %p1677_p5 = scmp.ne.s32.totalorder (!%p1676_p0), %s1669_s18, 0 }
  0x4c   : > { %177 = sbr.rel (%p1676_p0) target bundleno = 438 (0x1b6), region = 28  ;;  %s869_s7 = sshll.u32 (!%p1676_p0), %s1419_s6, 7 }
  0x4d   : > { %s180_s10 = scalar_lea.sflag (!%p1676_p0), [#allocation3], %s1419_s6  ;;  %s1423_s11 = scalar_lea.vmem (!%p1676_p0), [#allocation2], %s869_s7 }
  0x53   : > { %1215 = dma.done.wait (%p1677_p5), %s180_s10, 2048  }
  0x54   : > { %1217 = vsyncadd (%p1677_p5), %s180_s10, 4294965248  ;;  %p1678_p11 = scmp.eq.s32.totalorder %s1295_s16, 0 }
  0x56   : > { %1219 = dma.done.wait (%p1678_p11), [#allocation6], 1024   ;;  %p1679_p2 = pmov %p1678_p11 }
  0x57   : > { %v1060_v0 = vld [vmem:[#allocation5] sm:$0xff]   ;;  %v1061_v1 = vld [vmem:[#allocation5 + $0x8] sm:$0xff]   ;;  %v1062_v2 = vld [vmem:[#allocation5 + $0x10] sm:$0xff]   ;;  %s871_s18 = sshll.u32 %s1419_s6, 8  ;;  %s905_s8 = sshll.u32 %s1295_s16, 12 }
  0x58   : > { %1221 = vsyncadd (%p1679_p2), [#allocation6], 4294966272  ;;  %930 = vmatprep.subr.bf16.mxu0 %v1060_v0  ;;  %978 = vmatprep.subr.bf16.mxu1 %v1060_v0  ;;  %v1063_v3 = vld [vmem:[#allocation5 + $0x18] sm:$0xff]   ;;  %v1068_v4 = vld [vmem:[%s1423_s11] sm:$0xff]   ;;  %s1452_s20 = scalar_lea.vmem [#allocation7], %s871_s18  ;;  %s1524_s26 = scalar_lea.hbm %s1664_s2, %s905_s8 }
  0x59   : > { %931 = vmatpush3.bf16.msra.mxu0 %v1060_v0  ;;  %986 = vmatpush3.bf16.msra.mxu1 %v1060_v0  ;;  %v1064_v5 = vld [vmem:[#allocation5 + $0x20] sm:$0xff]   ;;  %v1065_v6 = vld [vmem:[#allocation5 + $0x28] sm:$0xff]   ;;  %v1066_v8 = vld [vmem:[#allocation5 + $0x30] sm:$0xff]   ;;  %s733_s9 = sshll.u32 %s1452_s20, 4  ;;  %s715_s5 = scalar_lea.sflag [#allocation4], %s1419_s6  ;;  %s1526_s9 = int_to_ptr.vmem [resolvable:$true] %s733_s9 }
  0x5a   : > { %932 = vmatprep.subr.bf16.mxu0 %v1061_v1  ;;  %979 = vmatprep.subr.bf16.mxu1 %v1061_v1  ;;  %v1076_v7 = vld [vmem:[%s1423_s11 + $0x40] sm:$0xff]   ;;  %v1067_v9 = vld [vmem:[#allocation5 + $0x38] sm:$0xff]   ;;  %v1069_v10 = vld [vmem:[%s1423_s11 + $0x8] sm:$0xff]   ;;  %s1142_s27 = scalar_lea.vmem %s1526_s9, 4096  ;;  %s1250_s28 = smov [#allocation7]  }
  0x5b   : > { %946 = vmatprep.mubr.bf16.mxu0 %v1068_v4  ;;  %962 = vmatprep.mubr.bf16.mxu1 %v1076_v7  ;;  %v1077_v11 = vld [vmem:[%s1423_s11 + $0x48] sm:$0xff]   ;;  %v1070_v12 = vld [vmem:[%s1423_s11 + $0x10] sm:$0xff]   ;;  %v1071_v14 = vld [vmem:[%s1423_s11 + $0x18] sm:$0xff]   ;;  %p1143_p4 = scmp.ne.s32.totalorder %s1526_s9, %s1142_s27  ;;  %s1146_s23 = sshll.u32 %s1250_s28, 4  ;;  %s1147_s23 = int_to_ptr.vmem [resolvable:$false] %s1146_s23 }
  0x5c   : > { %v1078_v13 = vld [vmem:[%s1423_s11 + $0x50] sm:$0xff]   ;;  %v1079_v15 = vld [vmem:[%s1423_s11 + $0x58] sm:$0xff]   ;;  %v1072_v16 = vld [vmem:[%s1423_s11 + $0x20] sm:$0xff]   ;;  %s1148_s29 = scalar_lea.vmem %s1147_s23, 8192  ;;  %p1149_p10 = scmp.lt.s32.totalorder %s1526_s9, %s1147_s23 }
  0x5d   : > { %933 = vmatpush3.bf16.msra.mxu0 %v1061_v1  ;;  %987 = vmatpush3.bf16.msra.mxu1 %v1061_v1  ;;  %v1080_v17 = vld [vmem:[%s1423_s11 + $0x60] sm:$0xff]   ;;  %v1073_v18 = vld [vmem:[%s1423_s11 + $0x28] sm:$0xff]   ;;  %v1074_v20 = vld [vmem:[%s1423_s11 + $0x30] sm:$0xff]   ;;  %p1144_p6 = pnand %p1143_p4, %p1368_p12  ;;  %p1150_p13 = scmp.lt.s32.totalorder %s1148_s29, %s1142_s27 }
  0x5e   : > { %934 = vmatprep.subr.bf16.mxu0 %v1062_v2  ;;  %980 = vmatprep.subr.bf16.mxu1 %v1062_v2  ;;  %v1081_v19 = vld [vmem:[%s1423_s11 + $0x68] sm:$0xff]   ;;  %v1082_v21 = vld [vmem:[%s1423_s11 + $0x70] sm:$0xff]   ;;  %v1075_v22 = vld [vmem:[%s1423_s11 + $0x38] sm:$0xff]  }
  0x5f   : > { %v1083_v23 = vld [vmem:[%s1423_s11 + $0x78] sm:$0xff]   ;;  %p1145_p8 = pneg %p1144_p6  ;;  %p1151_p3 = por %p1150_p13, %p1149_p10 }
  0x61   : > { %935 = vmatpush3.bf16.msra.mxu0 %v1062_v2  ;;  %988 = vmatpush3.bf16.msra.mxu1 %v1062_v2  ;;  %p1152_p7 = pnand %p1151_p3, %p1145_p8 }
  0x62   : > { %936 = vmatprep.subr.bf16.mxu0 %v1063_v3  ;;  %981 = vmatprep.subr.bf16.mxu1 %v1063_v3 }
  0x65   : > { %937 = vmatpush3.bf16.msra.mxu0 %v1063_v3  ;;  %989 = vmatpush3.bf16.msra.mxu1 %v1063_v3 }
  0x66   : > { %938 = vmatprep.subr.bf16.mxu0 %v1064_v5  ;;  %982 = vmatprep.subr.bf16.mxu1 %v1064_v5 }
  0x69   : > { %939 = vmatpush3.bf16.msra.mxu0 %v1064_v5  ;;  %990 = vmatpush3.bf16.msra.mxu1 %v1064_v5 }
  0x6a   : > { %940 = vmatprep.subr.bf16.mxu0 %v1065_v6  ;;  %983 = vmatprep.subr.bf16.mxu1 %v1065_v6 }
  0x6d   : > { %941 = vmatpush3.bf16.msra.mxu0 %v1065_v6  ;;  %991 = vmatpush3.bf16.msra.mxu1 %v1065_v6 }
  0x6e   : > { %942 = vmatprep.subr.bf16.mxu0 %v1066_v8  ;;  %984 = vmatprep.subr.bf16.mxu1 %v1066_v8 }
  0x71   : > { %943 = vmatpush3.bf16.msra.mxu0 %v1066_v8  ;;  %992 = vmatpush3.bf16.msra.mxu1 %v1066_v8 }
  0x72   : > { %944 = vmatprep.subr.bf16.mxu0 %v1067_v9  ;;  %985 = vmatprep.subr.bf16.mxu1 %v1067_v9 }
  0x75   : > { %945 = vmatpush3.bf16.msra.mxu0 %v1067_v9  ;;  %993 = vmatpush3.bf16.msra.mxu1 %v1067_v9 }
  0x78   : > { %947 = vmatmul.mubr.bf16.vlgmr.msra.gmra.mrb[0].mxu0 %v1069_v10  ;;  %963 = vmatmul.mubr.bf16.vlgmr.msra.gmra.mrb[0].mxu1 %v1077_v11 }
  0x79   : > { %950 = vmatprep.mubr.bf16.mxu0 %v1070_v12  ;;  %966 = vmatprep.mubr.bf16.mxu1 %v1078_v13 }
  0x80   : > { %951 = vmatmul.mubr.bf16.gmra.mrb[4].mxu0 %v1071_v14  ;;  %967 = vmatmul.mubr.bf16.gmra.mrb[4].mxu1 %v1079_v15 }
  0x81   : > { %954 = vmatprep.mubr.bf16.mxu0 %v1072_v16  ;;  %970 = vmatprep.mubr.bf16.mxu1 %v1080_v17 }
  0x88   : > { %955 = vmatmul.mubr.bf16.gmra.mrb[8].mxu0 %v1073_v18  ;;  %971 = vmatmul.mubr.bf16.gmra.mrb[8].mxu1 %v1081_v19 }
  0x89   : > { %958 = vmatprep.mubr.bf16.mxu0 %v1074_v20  ;;  %974 = vmatprep.mubr.bf16.mxu1 %v1082_v21 }
  0x90   : > { %959 = vmatmul.mubr.bf16.gmra.mrb[12].mxu0 %v1075_v22  ;;  %975 = vmatmul.mubr.bf16.gmra.mrb[12].mxu1 %v1083_v23 }
 0x14b   : > { %v948_v24 = vpop.f32.mrb[0].mxu0  ;;  %v1450_v25 = vpop.f32.mrb[0].mxu1 }
 0x14c   : > { %573 = vst [vmem:[%s1452_s20 + $0x10] sm:$0xff] %v948_v24  ;;  %v444_v26 = vpop.f32.mrb[1].mxu0  ;;  %589 = vst [vmem:[%s1452_s20 + $0x90] sm:$0xff] %v1450_v25  ;;  %v1457_v27 = vpop.f32.mrb[1].mxu1  ;;  %v642_v35 = vmul.f32 %v948_v24, %v948_v24 }
 0x14d   : > { %571 = vst [vmem:[%s1452_s20] sm:$0xff] %v444_v26  ;;  %v949_v28 = vpop.f32.mrb[2].mxu0  ;;  %587 = vst [vmem:[%s1452_s20 + $0x80] sm:$0xff] %v1457_v27  ;;  %v1462_v29 = vpop.f32.mrb[2].mxu1  ;;  %v640_v32 = vmul.f32 %v444_v26, %v444_v26 }
 0x14e   : > { %574 = vst [vmem:[%s1452_s20 + $0x18] sm:$0xff] %v949_v28  ;;  %v447_v30 = vpop.f32.mrb[3].mxu0  ;;  %590 = vst [vmem:[%s1452_s20 + $0x98] sm:$0xff] %v1462_v29  ;;  %v1467_v31 = vpop.f32.mrb[3].mxu1  ;;  %v643_v38 = vmul.f32 %v949_v28, %v949_v28 }
 0x14f   : > { %572 = vst [vmem:[%s1452_s20 + $0x8] sm:$0xff] %v447_v30  ;;  %v603_v33 = vadd.f32 %v447_v30, %v444_v26  ;;  %v641_v34 = vmul.f32 %v447_v30, %v447_v30  ;;  %588 = vst [vmem:[%s1452_s20 + $0x88] sm:$0xff] %v1467_v31 }
 0x151   : > { %v604_v36 = vadd.f32 %v948_v24, %v603_v33  ;;  %v672_v37 = vadd.f32 %v641_v34, %v640_v32 }
 0x153   : > { %v673_v39 = vadd.f32 %v672_v37, %v642_v35  ;;  %v952_v40 = vpop.f32.mrb[4].mxu0  ;;  %v605_v41 = vadd.f32 %v949_v28, %v604_v36  ;;  %v1472_v42 = vpop.f32.mrb[4].mxu1 }
 0x154   : > { %577 = vst [vmem:[%s1452_s20 + $0x30] sm:$0xff] %v952_v40  ;;  %v460_v43 = vpop.f32.mrb[5].mxu0  ;;  %593 = vst [vmem:[%s1452_s20 + $0xb0] sm:$0xff] %v1472_v42  ;;  %v1477_v44 = vpop.f32.mrb[5].mxu1  ;;  %v646_v55 = vmul.f32 %v952_v40, %v952_v40 }
 0x155   : > { %575 = vst [vmem:[%s1452_s20 + $0x20] sm:$0xff] %v460_v43  ;;  %v606_v45 = vadd.f32 %v605_v41, %v460_v43  ;;  %v644_v46 = vmul.f32 %v460_v43, %v460_v43  ;;  %v674_v47 = vadd.f32 %v673_v39, %v643_v38  ;;  %v953_v48 = vpop.f32.mrb[6].mxu0  ;;  %591 = vst [vmem:[%s1452_s20 + $0xa0] sm:$0xff] %v1477_v44  ;;  %v1482_v49 = vpop.f32.mrb[6].mxu1 }
 0x156   : > { %578 = vst [vmem:[%s1452_s20 + $0x38] sm:$0xff] %v953_v48  ;;  %v463_v50 = vpop.f32.mrb[7].mxu0  ;;  %594 = vst [vmem:[%s1452_s20 + $0xb8] sm:$0xff] %v1482_v49  ;;  %v1487_v51 = vpop.f32.mrb[7].mxu1  ;;  %v647_v58 = vmul.f32 %v953_v48, %v953_v48 }
 0x157   : > { %v675_v52 = vadd.f32 %v674_v47, %v644_v46  ;;  %576 = vst [vmem:[%s1452_s20 + $0x28] sm:$0xff] %v463_v50  ;;  %v607_v53 = vadd.f32 %v606_v45, %v463_v50  ;;  %v645_v54 = vmul.f32 %v463_v50, %v463_v50  ;;  %592 = vst [vmem:[%s1452_s20 + $0xa8] sm:$0xff] %v1487_v51 }
 0x159   : > { %v608_v56 = vadd.f32 %v952_v40, %v607_v53  ;;  %v676_v57 = vadd.f32 %v675_v52, %v645_v54 }
 0x15b   : > { %v677_v59 = vadd.f32 %v676_v57, %v646_v55  ;;  %v956_v60 = vpop.f32.mrb[8].mxu0  ;;  %v609_v61 = vadd.f32 %v953_v48, %v608_v56  ;;  %v1492_v62 = vpop.f32.mrb[8].mxu1 }
 0x15c   : > { %581 = vst [vmem:[%s1452_s20 + $0x50] sm:$0xff] %v956_v60  ;;  %v476_v63 = vpop.f32.mrb[9].mxu0  ;;  %597 = vst [vmem:[%s1452_s20 + $0xd0] sm:$0xff] %v1492_v62  ;;  %v1497_v0 = vpop.f32.mrb[9].mxu1  ;;  %v650_v11 = vmul.f32 %v956_v60, %v956_v60 }
 0x15d   : > { %579 = vst [vmem:[%s1452_s20 + $0x40] sm:$0xff] %v476_v63  ;;  %v610_v1 = vadd.f32 %v609_v61, %v476_v63  ;;  %v648_v2 = vmul.f32 %v476_v63, %v476_v63  ;;  %v678_v3 = vadd.f32 %v677_v59, %v647_v58  ;;  %v957_v4 = vpop.f32.mrb[10].mxu0  ;;  %595 = vst [vmem:[%s1452_s20 + $0xc0] sm:$0xff] %v1497_v0  ;;  %v1502_v5 = vpop.f32.mrb[10].mxu1 }
 0x15e   : > { %582 = vst [vmem:[%s1452_s20 + $0x58] sm:$0xff] %v957_v4  ;;  %v479_v6 = vpop.f32.mrb[11].mxu0  ;;  %598 = vst [vmem:[%s1452_s20 + $0xd8] sm:$0xff] %v1502_v5  ;;  %v1507_v7 = vpop.f32.mrb[11].mxu1  ;;  %v651_v14 = vmul.f32 %v957_v4, %v957_v4 }
 0x15f   : > { %v679_v8 = vadd.f32 %v678_v3, %v648_v2  ;;  %580 = vst [vmem:[%s1452_s20 + $0x48] sm:$0xff] %v479_v6  ;;  %v611_v9 = vadd.f32 %v610_v1, %v479_v6  ;;  %v649_v10 = vmul.f32 %v479_v6, %v479_v6  ;;  %596 = vst [vmem:[%s1452_s20 + $0xc8] sm:$0xff] %v1507_v7 }
 0x161   : > { %v612_v12 = vadd.f32 %v956_v60, %v611_v9  ;;  %v680_v13 = vadd.f32 %v679_v8, %v649_v10 }
 0x163   : > { %v681_v15 = vadd.f32 %v680_v13, %v650_v11  ;;  %v960_v16 = vpop.f32.mrb[12].mxu0  ;;  %v613_v17 = vadd.f32 %v957_v4, %v612_v12  ;;  %v1514_v18 = vpop.f32.mrb[12].mxu1 }
 0x164   : > { %585 = vst [vmem:[%s1452_s20 + $0x70] sm:$0xff] %v960_v16  ;;  %v492_v19 = vpop.f32.mrb[13].mxu0  ;;  %601 = vst [vmem:[%s1452_s20 + $0xf0] sm:$0xff] %v1514_v18  ;;  %v1519_v20 = vpop.f32.mrb[13].mxu1 }
 0x165   : > { %583 = vst [vmem:[%s1452_s20 + $0x60] sm:$0xff] %v492_v19  ;;  %v614_v21 = vadd.f32 %v613_v17, %v492_v19  ;;  %v652_v22 = vmul.f32 %v492_v19, %v492_v19  ;;  %v682_v23 = vadd.f32 %v681_v15, %v651_v14  ;;  %v961_v24 = vpop.f32.mrb[14].mxu0  ;;  %599 = vst [vmem:[%s1452_s20 + $0xe0] sm:$0xff] %v1519_v20  ;;  %v1531_v26 = vpop.f32.mrb[14].mxu1 }
 0x166   : > { %586 = vst [vmem:[%s1452_s20 + $0x78] sm:$0xff] %v961_v24  ;;  %v495_v28 = vpop.f32.mrb[15].mxu0  ;;  %602 = vst [vmem:[%s1452_s20 + $0xf8] sm:$0xff] %v1531_v26  ;;  %v1536_v30 = vpop.f32.mrb[15].mxu1 }
 0x167   : > { %v683_v32 = vadd.f32 %v682_v23, %v652_v22  ;;  %584 = vst [vmem:[%s1452_s20 + $0x68] sm:$0xff] %v495_v28  ;;  %v615_v33 = vadd.f32 %v614_v21, %v495_v28  ;;  %v653_v34 = vmul.f32 %v495_v28, %v495_v28  ;;  %600 = vst [vmem:[%s1452_s20 + $0xe8] sm:$0xff] %v1536_v30 }
 0x168   : > { %1155 = shalt.err (!%p1152_p7)
}
 0x169   : > { %s1156_s30 = scalar_lea.hbm %s1524_s26, 4096  ;;  %s1160_s10 = scalar_lea.hbm %s1664_s2, 8192 }
 0x16a   : > { %p1157_p9 = scmp.ne.s32.totalorder %s1524_s26, %s1156_s30  ;;  %p1161_p5 = scmp.lt.u32.totalorder %s1524_s26, %s1664_s2 }
 0x16b   : > { %p1162_p11 = scmp.lt.u32.totalorder %s1160_s10, %s1156_s30  ;;  %p1164_p4 = scmp.lt.u32.totalorder %s1156_s30, %s1524_s26 }
 0x16c   : > { %p1158_p1 = pnand %p1157_p9, %p1368_p12 }
 0x16d   : > { %p1163_p2 = por %p1162_p11, %p1161_p5 }
 0x16e   : > { %p1159_p0 = pneg %p1158_p1 }
 0x16f   : > { %p1165_p6 = por %p1164_p4, %p1163_p2 }
 0x171   : > { %p1166_p8 = pnand %p1165_p6, %p1159_p0 }
 0x173   : > { %1169 = shalt.err (!%p1166_p8)
}
 0x174   : > { %s1251_s20 = smov 128   ;;  %s1252_s8 = smov 8   ;;  %v654_v35 = vmul.f32 %v960_v16, %v960_v16  ;;  %v616_v36 = vadd.f32 %v960_v16, %v615_v33  ;;  %v684_v37 = vadd.f32 %v683_v32, %v653_v34  ;;  %v655_v38 = vmul.f32 %v961_v24, %v961_v24 }
 0x175   : > { %1000 = dma.vmem_to_hbm [thread:$0]  (%p1368_p12), %s1526_s9, 4096, %s1524_s26, %s715_s5, %s1251_s20, %s1251_s20, %s1252_s8   ;;  %v656_v41 = vmul.f32 %v1457_v27, %v1457_v27  ;;  %v657_v48 = vmul.f32 %v1467_v31, %v1467_v31  ;;  %v658_v50 = vmul.f32 %v1450_v25, %v1450_v25  ;;  %v659_v54 = vmul.f32 %v1462_v29, %v1462_v29 }
 0x176   : > { %v685_v39 = vadd.f32 %v684_v37, %v654_v35  ;;  %v617_v40 = vadd.f32 %v961_v24, %v616_v36  ;;  %v661_v60 = vmul.f32 %v1487_v51, %v1487_v51  ;;  %v665_v8 = vmul.f32 %v1507_v7, %v1507_v7  ;;  %s872_s9 = sshll.u32 %s1419_s6, 3  ;;  %s901_s4 = sshll.u32 %s1295_s16, 7 }
 0x177   : > { %v670_v16 = vmul.f32 %v1514_v18, %v1514_v18  ;;  %vm709_vm0 = vcmask 1040384   ;;  %s214_s25 = scalar_lea.vmem [#allocation8], %s872_s9  ;;  %vm711_vm1 = vcmask 1041408   ;;  %s1618_s28 = scalar_lea.hbm %s1665_s3, %s901_s4 }
 0x178   : > { %v618_v43 = vadd.f32 %v617_v40, %v1457_v27  ;;  %v686_v45 = vadd.f32 %v685_v39, %v655_v38  ;;  %v660_v27 = vmul.f32 %v1477_v44, %v1477_v44  ;;  %s749_s26 = sshll.u32 %s214_s25, 4  ;;  %s720_s23 = scalar_lea.sflag [#allocation9], %s1419_s6  ;;  %s1620_s26 = int_to_ptr.vmem [resolvable:$true] %s749_s26 }
 0x179   : > { %s1170_s16 = scalar_lea.vmem %s1620_s26, 128  ;;  %s1253_s29 = smov [#allocation8]  }
 0x17a   : > { %v687_v46 = vadd.f32 %v686_v45, %v656_v41  ;;  %v619_v47 = vadd.f32 %v618_v43, %v1467_v31  ;;  %p1171_p10 = scmp.ne.s32.totalorder %s1620_s26, %s1170_s16  ;;  %s1174_s30 = sshll.u32 %s1253_s29, 4  ;;  %s1175_s30 = int_to_ptr.vmem [resolvable:$false] %s1174_s30 }
 0x17b   : > { %s1176_s22 = scalar_lea.vmem %s1175_s30, 256  ;;  %p1177_p7 = scmp.lt.s32.totalorder %s1620_s26, %s1175_s30 }
 0x17c   : > { %v620_v52 = vadd.f32 %v1450_v25, %v619_v47  ;;  %v688_v53 = vadd.f32 %v687_v46, %v657_v48  ;;  %v662_v25 = vmul.f32 %v1472_v42, %v1472_v42  ;;  %p1172_p13 = pnand %p1171_p10, %p1368_p12  ;;  %p1178_p9 = scmp.lt.s32.totalorder %s1176_s22, %s1170_s16 }
 0x17e   : > { %v689_v55 = vadd.f32 %v688_v53, %v658_v50  ;;  %v621_v56 = vadd.f32 %v1462_v29, %v620_v52  ;;  %v663_v29 = vmul.f32 %v1482_v49, %v1482_v49  ;;  %p1173_p3 = pneg %p1172_p13  ;;  %p1179_p1 = por %p1178_p9, %p1177_p7 }
 0x180   : > { %v622_v57 = vadd.f32 %v621_v56, %v1477_v44  ;;  %v690_v58 = vadd.f32 %v689_v55, %v659_v54  ;;  %v664_v44 = vmul.f32 %v1497_v0, %v1497_v0  ;;  %p1180_p0 = pnand %p1179_p1, %p1173_p3 }
 0x182   : > { %v691_v59 = vadd.f32 %v690_v58, %v660_v27  ;;  %v623_v31 = vadd.f32 %v622_v57, %v1487_v51 }
 0x184   : > { %v624_v61 = vadd.f32 %v1472_v42, %v623_v31  ;;  %v692_v63 = vadd.f32 %v691_v59, %v661_v60  ;;  %v666_v42 = vmul.f32 %v1492_v62, %v1492_v62 }
 0x186   : > { %v693_v1 = vadd.f32 %v692_v63, %v662_v25  ;;  %v625_v2 = vadd.f32 %v1482_v49, %v624_v61  ;;  %v667_v49 = vmul.f32 %v1502_v5, %v1502_v5 }
 0x188   : > { %v626_v3 = vadd.f32 %v625_v2, %v1497_v0  ;;  %v694_v4 = vadd.f32 %v693_v1, %v663_v29  ;;  %v668_v0 = vmul.f32 %v1519_v20, %v1519_v20 }
 0x18a   : > { %v695_v6 = vadd.f32 %v694_v4, %v664_v44  ;;  %v627_v51 = vadd.f32 %v626_v3, %v1507_v7 }
 0x18c   : > { %v628_v9 = vadd.f32 %v1492_v62, %v627_v51  ;;  %v696_v10 = vadd.f32 %v695_v6, %v665_v8  ;;  %v669_v62 = vmul.f32 %v1536_v30, %v1536_v30 }
 0x18e   : > { %v697_v11 = vadd.f32 %v696_v10, %v666_v42  ;;  %v629_v12 = vadd.f32 %v1502_v5, %v628_v9  ;;  %v671_v5 = vmul.f32 %v1531_v26, %v1531_v26 }
 0x190   : > { %v630_v13 = vadd.f32 %v629_v12, %v1519_v20  ;;  %v698_v14 = vadd.f32 %v697_v11, %v667_v49 }
 0x192   : > { %v699_v7 = vadd.f32 %v698_v14, %v668_v0  ;;  %v631_v15 = vadd.f32 %v630_v13, %v1536_v30 }
 0x194   : > { %v632_v17 = vadd.f32 %v1514_v18, %v631_v15  ;;  %v700_v19 = vadd.f32 %v699_v7, %v669_v62 }
 0x196   : > { %v633_v20 = vadd.f32 %v1531_v26, %v632_v17  ;;  %v701_v21 = vadd.f32 %v700_v19, %v670_v16 }
 0x198   : > { %v634_v22 = vrot.slane %v633_v20, 4  ;;  %v702_v23 = vadd.f32 %v701_v21, %v671_v5 }
 0x19a   : > { %v635_v24 = vadd.f32 %v634_v22, %v633_v20  ;;  %v703_v28 = vrot.slane %v702_v23, 4 }
 0x19c   : > { %v636_v32 = vrot.slane %v635_v24, 2  ;;  %v704_v33 = vadd.f32 %v703_v28, %v702_v23 }
 0x19e   : > { %v637_v30 = vadd.f32 %v636_v32, %v635_v24  ;;  %v705_v34 = vrot.slane %v704_v33, 2 }
 0x1a0   : > { %v638_v35 = vrot.slane %v637_v30, 1  ;;  %v706_v18 = vadd.f32 %v705_v34, %v704_v33 }
 0x1a2   : > { %v707_v36 = vrot.slane %v706_v18, 1  ;;  %v639_v26 = vadd.f32 %v638_v35, %v637_v30 }
 0x1a4   : > { %v708_v37 = vadd.f32 %v707_v36, %v706_v18 }
 0x1a6   : > { %v710_v38 = vsel %vm709_vm0, %v639_v26, %v708_v37 }
 0x1a7   : > { %v712_v39 = vsel %vm711_vm1, %v710_v38, 0.0 }
 0x1a8   : > { %713 = vst [vmem:[%s214_s25] sm:$0xff] %v712_v39 }
 0x1a9   : > { %1183 = shalt.err (!%p1180_p0)
}
 0x1aa   : > { %s1184_s6 = scalar_lea.hbm %s1618_s28, 128  ;;  %s1188_s11 = scalar_lea.hbm %s1665_s3, 256 }
 0x1ab   : > { %p1185_p5 = scmp.ne.s32.totalorder %s1618_s28, %s1184_s6  ;;  %p1189_p4 = scmp.lt.u32.totalorder %s1618_s28, %s1665_s3 }
 0x1ac   : > { %p1190_p6 = scmp.lt.u32.totalorder %s1188_s11, %s1184_s6  ;;  %p1192_p10 = scmp.lt.u32.totalorder %s1184_s6, %s1618_s28 }
 0x1ad   : > { %p1186_p11 = pnand %p1185_p5, %p1368_p12 }
 0x1ae   : > { %p1191_p8 = por %p1190_p6, %p1189_p4 }
 0x1af   : > { %p1187_p2 = pneg %p1186_p11 }
 0x1b0   : > { %p1193_p13 = por %p1192_p10, %p1191_p8 }
 0x1b2   : > { %p1194_p3 = pnand %p1193_p13, %p1187_p2 }
 0x1b4   : > { %1197 = shalt.err (!%p1194_p3)
}
 0x1b5   : > { %1001 = dma.vmem_to_hbm [thread:$0]  (%p1368_p12), %s1620_s26, 128, %s1618_s28, %s720_s23  }
 0x1b6 PF: > { %s761_s8 = sand.u32 1, %s1232_s12   ;;  %p1680_p7 = scmp.ne.s32.totalorder %s1670_s19, 0 }
 0x1b7   : > { %p1681_p9 = scmp.ge.s32.totalorder %s1244_s15, 2  ;;  %s762_s9 = scalar_lea.sflag [#allocation4], %s761_s8 }
 0x1b9   : > { %p1013_p1 = pnand %p1681_p9, %p1680_p7 }
 0x1bb   : > { %1223 = dma.done.wait (!%p1013_p1), %s762_s9, 4096  }
 0x1bc   : > { %1225 = vsyncadd (!%p1013_p1), %s762_s9, 4294963200  ;;  %s771_s4 = scalar_lea.sflag [#allocation9], %s761_s8 }
 0x1bd   : > { %1227 = dma.done.wait (!%p1013_p1), %s771_s4, 128  }
 0x1be   : > { %1229 = vsyncadd (!%p1013_p1), %s771_s4, 4294967168  ;;  %p21_p12 = scmp.ge.s32.totalorder %s1330_s24, 4   ;;  %s1682_s12 = smov %s1236_s13 }
 0x1bf   : > { %s1683_s13 = smov %s1240_s14  ;;  %s1684_s14 = smov %s1364_s17 }
 0x1c0   : > { %s1685_s15 = smov %s1330_s24  ;;  %23 = sbr.rel (!%p21_p12) target bundleno = 8 (0x8), region = 94 }
 0x1c7   :  { %776 = vsyncpa [#allocation3], 1 }
 0x1c8   :  { %778 = vsyncpa [#allocation3 + $0x1], 1 }
 0x1c9   :  { %779 = vsyncpa [#allocation6], 1 }
 0x1ca   :  { %780 = vsyncpa [#allocation4], 1 }
 0x1cb   :  { %782 = vsyncpa [#allocation4 + $0x1], 1 }
 0x1cc   :  { %783 = vsyncpa [#allocation9], 1 }
 0x1cd   :  { %785 = vsyncpa [#allocation9 + $0x1], 1 }

</bundles_post_ra>
